<compile_context>
chip_gen: v7x
topology: tpu7x:2x2x1
jax: 0.10.0
libtpu: 0.0.40
codegen_flags: <defaults>
</compile_context>

<pallas_src>
import jax
import jax.numpy as jnp
from jax.experimental import pallas as pl
from jax.experimental.pallas import tpu as pltpu


def _round_up(x, m):
    return ((x + m - 1) // m) * m


def _op_head_kernel(x_ref, batch_ref, fi_ref, th_ref,
                    w1m_ref, w1f_ref, w1t_ref, b1_ref,
                    w2_ref, b2_ref, out_ref, acc_ref):
    """Grid axis 0 iterates over node tiles (reduction axis, 'arbitrary').

    acc_ref is a persistent [B, D] f32 VMEM accumulator holding the running
    global_add_pool result; the MLP + output store run only on the last step.
    """
    step = pl.program_id(0)

    @pl.when(step == 0)
    def _init():
        acc_ref[...] = jnp.zeros_like(acc_ref)

    # --- global_add_pool partial: one_hot [B, TILE_N] @ x_tile [TILE_N, D] on the MXU ---
    x = x_ref[...]                        # [TILE_N, D]  streamed (bf16)
    batch = batch_ref[...]                # [1, TILE_N]  int32 graph id per node
    B = acc_ref.shape[0]
    tile_n = x.shape[0]

    graph_ids = jax.lax.broadcasted_iota(jnp.int32, (B, tile_n), 0)
    # Compare in int32 on the VPU; cast to the streaming dtype only at the MXU push.
    one_hot = (graph_ids == batch).astype(x.dtype)          # exact 0/1 values
    acc_ref[...] += jnp.dot(one_hot, x, preferred_element_type=jnp.float32)

    # --- finalize: MLP on the pooled graph representation ---
    @pl.when(step == pl.num_programs(0) - 1)
    def _finalize():
        pooled = acc_ref[...]                                # [B, D] f32
        # concat([pooled, fi, th]) @ W1 + b1 == pooled @ W1m + fi*W1f + th*W1t + b1
        bias = fi_ref[...] * w1f_ref[...] + th_ref[...] * w1t_ref[...] + b1_ref[...]
        h = jnp.dot(pooled, w1m_ref[...], preferred_element_type=jnp.float32) + bias
        h = jnp.where(h > 0, h, 0.01 * h)                    # LeakyReLU(0.01)
        out = jnp.dot(h, w2_ref[...], preferred_element_type=jnp.float32) + b2_ref[...]
        out_ref[...] = out.astype(out_ref.dtype)


def operator_selection_head(x_nodes, batch_ids, feature_index, threshold,
                            w1, b1, w2, b2, *, tile_n=2048,
                            stream_dtype=jnp.bfloat16):
    """x_nodes: [N, D] backbone node embeddings; batch_ids: [N] int; feature_index,
    threshold: [B] float. w1: [D+2, H], b1: [H], w2: [H, 2], b2: [2]."""
    N, D = x_nodes.shape
    B = feature_index.shape[0]
    H = w1.shape[1]
    OUT = w2.shape[1]

    # Node (contraction) tile: multiple of 256 keeps the MXU cadence clean on v6e/v7x
    # (2x256 systolic arrays) and is also a multiple of 128 for v5e; cap by the padded
    # node count so small inputs stay single-step. ~2K rows x 128 lanes x bf16 x 2 bufs
    # is ~1 MiB of VMEM -> well inside v7x's 64 MiB physical / 32 MiB scoped budget.
    tile_n = min(_round_up(tile_n, 256), _round_up(N, 256))
    n_pad = _round_up(N, tile_n)
    grid = (n_pad // tile_n,)

    # Stream only the O(N) arrays in a narrow dtype; weights stay f32.
    x_p = jnp.pad(x_nodes.astype(stream_dtype), ((0, n_pad - N), (0, 0)))
    # Padded nodes get graph id B (out of range) -> dropped by the one-hot, same as segment_sum.
    batch_p = jnp.pad(batch_ids.astype(jnp.int32), (0, n_pad - N),
                      constant_values=B).reshape(1, n_pad)

    w1 = w1.astype(jnp.float32)
    w1_main = w1[:D]                      # [D, H]  — acts on pooled graph repr
    w1_fi = w1[D:D + 1]                   # [1, H]  — acts on feature_index column
    w1_th = w1[D + 1:D + 2]               # [1, H]  — acts on threshold column

    itemsize = jnp.dtype(stream_dtype).itemsize
    cost = pl.CostEstimate(
        flops=2 * B * N * D + 2 * B * D * H + 2 * B * H * OUT,
        transcendentals=0,
        bytes_accessed=(N * D * itemsize + N * 4
                        + (D * H + 3 * H + H * OUT + OUT) * 4
                        + 2 * B * 4 + B * OUT * 4),
    )

    # Grid-invariant blocks: DMA'd once, stay VMEM-resident across node tiles.
    def const(shape):
        return pl.BlockSpec(shape, lambda n: (0, 0))

    grid_spec = pltpu.PrefetchScalarGridSpec(
        num_scalar_prefetch=0,
        grid=grid,
        in_specs=[
            pl.BlockSpec((tile_n, D), lambda n: (n, 0)),      # x tile (pipelined)
            pl.BlockSpec((1, tile_n), lambda n: (0, n)),      # batch ids tile
            const((B, 1)),                                    # feature_index
            const((B, 1)),                                    # threshold
            const((D, H)),                                    # W1 main
            const((1, H)),                                    # W1 feature col
            const((1, H)),                                    # W1 threshold col
            const((1, H)),                                    # b1
            const((H, OUT)),                                  # W2
            const((1, OUT)),                                  # b2
        ],
        out_specs=pl.BlockSpec((B, OUT), lambda n: (0, 0)),
        scratch_shapes=[pltpu.VMEM((B, D), jnp.float32)],     # pooled accumulator
    )

    return pl.pallas_call(
        _op_head_kernel,
        out_shape=jax.ShapeDtypeStruct((B, OUT), jnp.float32),
        grid_spec=grid_spec,
        compiler_params=pltpu.CompilerParams(
            dimension_semantics=("arbitrary",),   # node axis is a reduction
            vmem_limit_bytes=32 * 1024 * 1024,    # explicit; safe on v5e/v6e/v7x
        ),
        cost_estimate=cost,
    )(
        x_p, batch_p,
        feature_index.reshape(B, 1).astype(jnp.float32),
        threshold.reshape(B, 1).astype(jnp.float32),
        w1_main, w1_fi, w1_th,
        b1.reshape(1, H).astype(jnp.float32),
        w2.astype(jnp.float32),
        b2.reshape(1, OUT).astype(jnp.float32),
    )


def _reference(x_nodes, batch_ids, feature_index, threshold, w1, b1, w2, b2):
    """Pure-JAX reference mirroring the PyTorch forward exactly (f32 throughout)."""
    B = feature_index.shape[0]
    pooled = jax.ops.segment_sum(x_nodes, batch_ids, num_segments=B)
    xcat = jnp.concatenate(
        [pooled, feature_index[:, None], threshold[:, None]], axis=1)
    h = xcat @ w1 + b1
    h = jnp.where(h > 0, h, 0.01 * h)
    return h @ w2 + b2


if __name__ == "__main__":
    # Small, module-consistent shapes (enough nodes to exercise multiple grid steps).
    B = 4               # number of graphs
    NODES_PER_GRAPH = 150
    N_NODES = B * NODES_PER_GRAPH       # 600 -> padded to 768, grid of 3 tiles of 256
    D_BACKBONE = 30     # backbone embedding dim
    INPUT_DIM = D_BACKBONE + 2          # pooled + feature_index + threshold
    HIDDEN = 32
    OUT = 2             # fixed by the module

    key = jax.random.PRNGKey(0)
    k_x, k_fi, k_th, k_w1, k_b1, k_w2, k_b2 = jax.random.split(key, 7)

    # "Backbone output": node embeddings + per-node graph assignment.
    x_nodes = jax.random.normal(k_x, (N_NODES, D_BACKBONE), dtype=jnp.float32)
    batch_ids = jnp.repeat(jnp.arange(B, dtype=jnp.int32), NODES_PER_GRAPH)

    feature_index = jax.random.randint(k_fi, (B,), 0, 8).astype(jnp.float32)
    threshold = jax.random.uniform(k_th, (B,), dtype=jnp.float32)

    # Deterministic MLP parameters (stored as [in, out]).
    w1 = 0.1 * jax.random.normal(k_w1, (INPUT_DIM, HIDDEN), dtype=jnp.float32)
    b1 = 0.1 * jax.random.normal(k_b1, (HIDDEN,), dtype=jnp.float32)
    w2 = 0.1 * jax.random.normal(k_w2, (HIDDEN, OUT), dtype=jnp.float32)
    b2 = 0.1 * jax.random.normal(k_b2, (OUT,), dtype=jnp.float32)

    out = operator_selection_head(x_nodes, batch_ids, feature_index, threshold,
                                  w1, b1, w2, b2, tile_n=256)
    out = jax.block_until_ready(out)

    ref = _reference(x_nodes, batch_ids, feature_index, threshold, w1, b1, w2, b2)
    assert out.shape == (B, OUT), out.shape
    # x is streamed in bf16 (f32 MXU accumulation), so tolerance is ~1e-2 relative.
    assert jnp.allclose(out, ref, atol=5e-2, rtol=2e-2), (out, ref)

    print("KERNEL_OK")
</pallas_src>

<mosaic_0001>
module attributes {stable_mosaic.version = 11 : i64} {
  func.func @_op_head_kernel(%arg0: i32, %arg1: memref<256x30xbf16, #tpu.memory_space<vmem>>, %arg2: memref<1x256xi32, #tpu.memory_space<vmem>>, %arg3: memref<4x1xf32, #tpu.memory_space<vmem>>, %arg4: memref<4x1xf32, #tpu.memory_space<vmem>>, %arg5: memref<30x32xf32, #tpu.memory_space<vmem>>, %arg6: memref<1x32xf32, #tpu.memory_space<vmem>>, %arg7: memref<1x32xf32, #tpu.memory_space<vmem>>, %arg8: memref<1x32xf32, #tpu.memory_space<vmem>>, %arg9: memref<32x2xf32, #tpu.memory_space<vmem>>, %arg10: memref<1x2xf32, #tpu.memory_space<vmem>>, %arg11: memref<4x2xf32, #tpu.memory_space<vmem>>, %arg12: memref<4x30xf32, #tpu.memory_space<vmem>>) attributes {dimension_semantics = [#tpu.dimension_semantics<arbitrary>], iteration_bounds = array<i64: 3>, scalar_prefetch = 0 : i64, scratch_operands = 1 : i64, tpu.core_type = #tpu.core_type<tc>, window_params = [{transform_indices = @transform_0, window_bounds = array<i64: 256, 30>}, {transform_indices = @transform_1, window_bounds = array<i64: 1, 256>}, {pipeline_mode = #tpu.pipeline_mode<synchronous>, transform_indices = @transform_2, window_bounds = array<i64: 4, 1>}, {pipeline_mode = #tpu.pipeline_mode<synchronous>, transform_indices = @transform_3, window_bounds = array<i64: 4, 1>}, {pipeline_mode = #tpu.pipeline_mode<synchronous>, transform_indices = @transform_4, window_bounds = array<i64: 30, 32>}, {pipeline_mode = #tpu.pipeline_mode<synchronous>, transform_indices = @transform_5, window_bounds = array<i64: 1, 32>}, {pipeline_mode = #tpu.pipeline_mode<synchronous>, transform_indices = @transform_6, window_bounds = array<i64: 1, 32>}, {pipeline_mode = #tpu.pipeline_mode<synchronous>, transform_indices = @transform_7, window_bounds = array<i64: 1, 32>}, {pipeline_mode = #tpu.pipeline_mode<synchronous>, transform_indices = @transform_8, window_bounds = array<i64: 32, 2>}, {pipeline_mode = #tpu.pipeline_mode<synchronous>, transform_indices = @transform_9, window_bounds = array<i64: 1, 2>}, {pipeline_mode = #tpu.pipeline_mode<synchronous>, transform_indices = @transform_10, window_bounds = array<i64: 4, 2>}]} {
    %c0_i32 = arith.constant 0 : i32
    %0 = arith.cmpi eq, %arg0, %c0_i32 : i32
    %1 = arith.extui %0 : i1 to i32
    %c0_i32_0 = arith.constant 0 : i32
    %2 = arith.cmpi ne, %1, %c0_i32_0 : i32
    scf.if %2 {
      %cst_9 = arith.constant 0.000000e+00 : f32
      %18 = vector.broadcast %cst_9 : f32 to vector<4x30xf32>
      %c0_10 = arith.constant 0 : index
      %c0_11 = arith.constant 0 : index
      %19 = vector.load %arg12[%c0_10, %c0_11] : memref<4x30xf32, #tpu.memory_space<vmem>>, vector<4x30xf32>
      tpu.vector_store %arg12[%c0_10, %c0_11], %18 {strides = array<i32>} : memref<4x30xf32, #tpu.memory_space<vmem>>, vector<4x30xf32>,
    } else {
    }
    %c0 = arith.constant 0 : index
    %c0_1 = arith.constant 0 : index
    %3 = vector.load %arg1[%c0, %c0_1] : memref<256x30xbf16, #tpu.memory_space<vmem>>, vector<256x30xbf16>
    %c0_2 = arith.constant 0 : index
    %c0_3 = arith.constant 0 : index
    %4 = vector.load %arg2[%c0_2, %c0_3] : memref<1x256xi32, #tpu.memory_space<vmem>>, vector<1x256xi32>
    %5 = tpu.iota {dimensions = array<i32: 0>} : vector<4x256xi32>
    %6 = vector.broadcast %4 : vector<1x256xi32> to vector<4x256xi32>
    %7 = arith.cmpi eq, %5, %6 : vector<4x256xi32>
    %8 = arith.extui %7 : vector<4x256xi1> to vector<4x256xi32>
    %9 = arith.sitofp %8 : vector<4x256xi32> to vector<4x256xf32>
    %10 = arith.truncf %9 : vector<4x256xf32> to vector<4x256xbf16>
    %c0_4 = arith.constant 0 : index
    %c0_5 = arith.constant 0 : index
    %11 = vector.load %arg12[%c0_4, %c0_5] : memref<4x30xf32, #tpu.memory_space<vmem>>, vector<4x30xf32>
    %cst = arith.constant dense<0.000000e+00> : vector<4x30xf32>
    %12 = tpu.matmul %10, %3, %cst {dimension_numbers = #tpu.dot_dimension_numbers<[1], [0], [0], [1], [0, 0, 1, 1], [], []>} : vector<4x256xbf16>, vector<256x30xbf16>, vector<4x30xf32> -> vector<4x30xf32>
    %13 = arith.addf %11, %12 : vector<4x30xf32>
    %c0_6 = arith.constant 0 : index
    %c0_7 = arith.constant 0 : index
    %14 = vector.load %arg12[%c0_6, %c0_7] : memref<4x30xf32, #tpu.memory_space<vmem>>, vector<4x30xf32>
    tpu.vector_store %arg12[%c0_6, %c0_7], %13 {strides = array<i32>} : memref<4x30xf32, #tpu.memory_space<vmem>>, vector<4x30xf32>,
    %c2_i32 = arith.constant 2 : i32
    %15 = arith.cmpi eq, %arg0, %c2_i32 : i32
    %16 = arith.extui %15 : i1 to i32
    %c0_i32_8 = arith.constant 0 : i32
    %17 = arith.cmpi ne, %16, %c0_i32_8 : i32
    scf.if %17 {
      %c0_9 = arith.constant 0 : index
      %c0_10 = arith.constant 0 : index
      %18 = vector.load %arg12[%c0_9, %c0_10] : memref<4x30xf32, #tpu.memory_space<vmem>>, vector<4x30xf32>
      %c0_11 = arith.constant 0 : index
      %c0_12 = arith.constant 0 : index
      %19 = vector.load %arg3[%c0_11, %c0_12] : memref<4x1xf32, #tpu.memory_space<vmem>>, vector<4x1xf32>
      %c0_13 = arith.constant 0 : index
      %c0_14 = arith.constant 0 : index
      %20 = vector.load %arg6[%c0_13, %c0_14] : memref<1x32xf32, #tpu.memory_space<vmem>>, vector<1x32xf32>
      %21 = vector.broadcast %19 : vector<4x1xf32> to vector<4x32xf32>
      %22 = vector.broadcast %20 : vector<1x32xf32> to vector<4x32xf32>
      %23 = arith.mulf %21, %22 : vector<4x32xf32>
      %c0_15 = arith.constant 0 : index
      %c0_16 = arith.constant 0 : index
      %24 = vector.load %arg4[%c0_15, %c0_16] : memref<4x1xf32, #tpu.memory_space<vmem>>, vector<4x1xf32>
      %c0_17 = arith.constant 0 : index
      %c0_18 = arith.constant 0 : index
      %25 = vector.load %arg7[%c0_17, %c0_18] : memref<1x32xf32, #tpu.memory_space<vmem>>, vector<1x32xf32>
      %26 = vector.broadcast %24 : vector<4x1xf32> to vector<4x32xf32>
      %27 = vector.broadcast %25 : vector<1x32xf32> to vector<4x32xf32>
      %28 = arith.mulf %26, %27 : vector<4x32xf32>
      %29 = arith.addf %23, %28 : vector<4x32xf32>
      %c0_19 = arith.constant 0 : index
      %c0_20 = arith.constant 0 : index
      %30 = vector.load %arg8[%c0_19, %c0_20] : memref<1x32xf32, #tpu.memory_space<vmem>>, vector<1x32xf32>
      %31 = vector.broadcast %30 : vector<1x32xf32> to vector<4x32xf32>
      %32 = arith.addf %29, %31 : vector<4x32xf32>
      %c0_21 = arith.constant 0 : index
      %c0_22 = arith.constant 0 : index
      %33 = vector.load %arg5[%c0_21, %c0_22] : memref<30x32xf32, #tpu.memory_space<vmem>>, vector<30x32xf32>
      %cst_23 = arith.constant dense<0.000000e+00> : vector<4x32xf32>
      %34 = tpu.matmul %18, %33, %cst_23 {dimension_numbers = #tpu.dot_dimension_numbers<[1], [0], [0], [1], [0, 0, 1, 1], [], []>} : vector<4x30xf32>, vector<30x32xf32>, vector<4x32xf32> -> vector<4x32xf32>
      %35 = arith.addf %34, %32 : vector<4x32xf32>
      %cst_24 = arith.constant 0.000000e+00 : f32
      %36 = vector.broadcast %cst_24 : f32 to vector<4x32xf32>
      %37 = arith.cmpf ogt, %35, %36 : vector<4x32xf32>
      %cst_25 = arith.constant 0.00999999977 : f32
      %38 = vector.broadcast %cst_25 : f32 to vector<4x32xf32>
      %39 = arith.mulf %38, %35 : vector<4x32xf32>
      %40 = arith.select %37, %35, %39 : vector<4x32xi1>, vector<4x32xf32>
      %c0_26 = arith.constant 0 : index
      %c0_27 = arith.constant 0 : index
      %41 = vector.load %arg9[%c0_26, %c0_27] : memref<32x2xf32, #tpu.memory_space<vmem>>, vector<32x2xf32>
      %cst_28 = arith.constant dense<0.000000e+00> : vector<4x2xf32>
      %42 = tpu.matmul %40, %41, %cst_28 {dimension_numbers = #tpu.dot_dimension_numbers<[1], [0], [0], [1], [0, 0, 1, 1], [], []>} : vector<4x32xf32>, vector<32x2xf32>, vector<4x2xf32> -> vector<4x2xf32>
      %c0_29 = arith.constant 0 : index
      %c0_30 = arith.constant 0 : index
      %43 = vector.load %arg10[%c0_29, %c0_30] : memref<1x2xf32, #tpu.memory_space<vmem>>, vector<1x2xf32>
      %44 = vector.broadcast %43 : vector<1x2xf32> to vector<4x2xf32>
      %45 = arith.addf %42, %44 : vector<4x2xf32>
      %c0_31 = arith.constant 0 : index
      %c0_32 = arith.constant 0 : index
      %46 = vector.load %arg11[%c0_31, %c0_32] : memref<4x2xf32, #tpu.memory_space<vmem>>, vector<4x2xf32>
      tpu.vector_store %arg11[%c0_31, %c0_32], %45 {strides = array<i32>} : memref<4x2xf32, #tpu.memory_space<vmem>>, vector<4x2xf32>,
    } else {
    }
    return
  }
  func.func @transform_0(%arg0: i32) -> (i32, i32) {
    %c0_i32 = arith.constant 0 : i32
    %c0_i32_0 = arith.constant 0 : i32
    return %arg0, %c0_i32 : i32, i32
  }
  func.func @transform_1(%arg0: i32) -> (i32, i32) {
    %c0_i32 = arith.constant 0 : i32
    %c0_i32_0 = arith.constant 0 : i32
    return %c0_i32, %arg0 : i32, i32
  }
  func.func @transform_2(%arg0: i32) -> (i32, i32) {
    %c0_i32 = arith.constant 0 : i32
    %c0_i32_0 = arith.constant 0 : i32
    %c0_i32_1 = arith.constant 0 : i32
    return %c0_i32, %c0_i32_0 : i32, i32
  }
  func.func @transform_3(%arg0: i32) -> (i32, i32) {
    %c0_i32 = arith.constant 0 : i32
    %c0_i32_0 = arith.constant 0 : i32
    %c0_i32_1 = arith.constant 0 : i32
    return %c0_i32, %c0_i32_0 : i32, i32
  }
  func.func @transform_4(%arg0: i32) -> (i32, i32) {
    %c0_i32 = arith.constant 0 : i32
    %c0_i32_0 = arith.constant 0 : i32
    %c0_i32_1 = arith.constant 0 : i32
    return %c0_i32, %c0_i32_0 : i32, i32
  }
  func.func @transform_5(%arg0: i32) -> (i32, i32) {
    %c0_i32 = arith.constant 0 : i32
    %c0_i32_0 = arith.constant 0 : i32
    %c0_i32_1 = arith.constant 0 : i32
    return %c0_i32, %c0_i32_0 : i32, i32
  }
  func.func @transform_6(%arg0: i32) -> (i32, i32) {
    %c0_i32 = arith.constant 0 : i32
    %c0_i32_0 = arith.constant 0 : i32
    %c0_i32_1 = arith.constant 0 : i32
    return %c0_i32, %c0_i32_0 : i32, i32
  }
  func.func @transform_7(%arg0: i32) -> (i32, i32) {
    %c0_i32 = arith.constant 0 : i32
    %c0_i32_0 = arith.constant 0 : i32
    %c0_i32_1 = arith.constant 0 : i32
    return %c0_i32, %c0_i32_0 : i32, i32
  }
  func.func @transform_8(%arg0: i32) -> (i32, i32) {
    %c0_i32 = arith.constant 0 : i32
    %c0_i32_0 = arith.constant 0 : i32
    %c0_i32_1 = arith.constant 0 : i32
    return %c0_i32, %c0_i32_0 : i32, i32
  }
  func.func @transform_9(%arg0: i32) -> (i32, i32) {
    %c0_i32 = arith.constant 0 : i32
    %c0_i32_0 = arith.constant 0 : i32
    %c0_i32_1 = arith.constant 0 : i32
    return %c0_i32, %c0_i32_0 : i32, i32
  }
  func.func @transform_10(%arg0: i32) -> (i32, i32) {
    %c0_i32 = arith.constant 0 : i32
    %c0_i32_0 = arith.constant 0 : i32
    %c0_i32_1 = arith.constant 0 : i32
    return %c0_i32, %c0_i32_0 : i32, i32
  }
}

</mosaic_0001>

<bundles_post_ra>
// kernel: tpu_custom_call.1
= control target key start
LH: loop header
LB: loop body
LE: loop exit
PB: predicated region body
PF: predicated region fallthrough
CT: control target
= control target key end

     0   :  { %s1024_s13 = smov 0   ;;  %s1119_s0 = inlined_call_operand.vmem [shape: bf16[768,30], index: 0, kind: input, shape index: {}]   ;;  %s1120_s1 = inlined_call_operand.vmem [shape: s32[1,768], index: 1, kind: input, shape index: {}]   ;;  %s1121_s2 = inlined_call_operand.vmem [shape: f32[4,1], index: 2, kind: input, shape index: {}]   ;;  %s1122_s3 = inlined_call_operand.vmem [shape: f32[4,1], index: 3, kind: input, shape index: {}]   ;;  %s1123_s4 = inlined_call_operand.vmem [shape: f32[30,32], index: 4, kind: input, shape index: {}]   ;;  %s1124_s5 = inlined_call_operand.vmem [shape: f32[1,32], index: 5, kind: input, shape index: {}]   ;;  %s1125_s6 = inlined_call_operand.vmem [shape: f32[1,32], index: 6, kind: input, shape index: {}]   ;;  %s1126_s7 = inlined_call_operand.vmem [shape: f32[1,32], index: 7, kind: input, shape index: {}]   ;;  %s1127_s8 = inlined_call_operand.vmem [shape: f32[32,2], index: 8, kind: input, shape index: {}]   ;;  %s1128_s9 = inlined_call_operand.vmem [shape: f32[1,2], index: 9, kind: input, shape index: {}]   ;;  %s1129_s10 = inlined_call_operand.vmem [shape: f32[4,2], index: 10, kind: output, shape index: {}]  }
   0x1 LB: > { %s1030_s14 = sadd.s32 4294967295, %s960_s13   ;;  %p818_p0 = scmp.ge.s32.totalorder %s960_s13, 1  ;;  %s960_s13 = sphi %s1024_s13, %s20_s13  }
   0x2   : > { %p318_p1 = scmp.lt.s32.totalorder %s960_s13, 4 }
   0x4   : > { %p319_p2 = pnand %p818_p0, %p318_p1 }
   0x5   : > { %s819_s15 = sshll.u32 (!%p319_p2), %s1030_s14, 5  ;;  %s821_s16 = sshll.u32 (!%p319_p2), %s1030_s14, 1 }
   0x6   : > { %322 = sbr.rel (%p319_p2) target bundleno = 712 (0x2c8), region = 60  ;;  %p356_p3 = scmp.lt.s32.totalorder (!%p319_p2), %s819_s15, 95 }
   0x7   : > { %p362_p4 = scmp.lt.s32.totalorder (!%p319_p2), %s821_s16, 5  ;;  %p822_p5 = scmp.ne.s32.totalorder (!%p319_p2), %s1030_s14, 0 }
   0xd   : > { %s1131_s15 = smov (!%p356_p3, %s819_s15), 95  ;;  %s1133_s16 = smov (!%p362_p4, %s821_s16), 5 }
   0xe   : > { %s820_s17 = sshll.u32 %s1131_s15, 2  ;;  %s364_s23 = scalar_lea.vmem %s1120_s1, %s1133_s16  ;;  %vm371_vm0 = vcmask (!%p822_p5), 240640   ;;  %v962_v0 = vmov (!%p822_p5), 0.0  }
   0xf   : > { %s1041_s20 = scalar_lea.vmem %s1119_s0, %s820_s17  ;;  %370 = sbr.rel (%p822_p5) target bundleno = 22 (0x16), region = 64  ;;  %372 = vst.msk [vmem:[#allocation2] sm:$0xf] (!%p822_p5), %vm371_vm0, %v962_v0 }
  0x16 PF: > { %v937_v1 = vld [vmem:[%s1041_s20 + $0x40] sm:$0xff]   ;;  %v939_v3 = vld [vmem:[%s1041_s20 + $0x48] sm:$0xff]   ;;  %v941_v5 = vld [vmem:[%s1041_s20 + $0x50] sm:$0xff]   ;;  %v406_v6 = vlaneseq  ;;  %v963_v20 = vmov 1.0|1.0   ;;  %vm562_vm5 = vcmask 240640  }
  0x17   : > { %v938_v2 = vld [vmem:[%s1041_s20] sm:$0xff]   ;;  %855 = vmatprep.subr.bf16.mxu0 %v937_v1  ;;  %v940_v4 = vld [vmem:[%s1041_s20 + $0x8] sm:$0xff]   ;;  %v942_v7 = vld [vmem:[%s1041_s20 + $0x10] sm:$0xff]   ;;  %p845_p6 = scmp.ne.s32.totalorder %s1030_s14, 2 }
  0x18   : > { %856 = vmatpush3.bf16.msra.mxu0 %v938_v2  ;;  %v943_v8 = vld [vmem:[%s1041_s20 + $0x58] sm:$0xff]   ;;  %v407_v9 = vshrl.u32 %v406_v6, 7  ;;  %v945_v11 = vld [vmem:[%s1041_s20 + $0x60] sm:$0xff]   ;;  %v947_v14 = vld [vmem:[%s1041_s20 + $0x68] sm:$0xff]   ;;  %vm614_vm6 = vcmask (!%p845_p6), 1045504   ;;  %v964_v35 = vmov (!%p845_p6), 0.0|0.0  }
  0x19   : > { %857 = vmatprep.subr.bf16.mxu0 %v939_v3  ;;  %v944_v10 = vld [vmem:[%s1041_s20 + $0x18] sm:$0xff]   ;;  %v946_v13 = vld [vmem:[%s1041_s20 + $0x20] sm:$0xff]   ;;  %v948_v17 = vld [vmem:[%s1041_s20 + $0x28] sm:$0xff]   ;;  %916 = vmatprep.subr.bf16.mxu1 (!%p845_p6), %v964_v35  ;;  %vm965_vm7 = vmmov (!%p845_p6), 0   ;;  %v966_v38 = vmov (!%p845_p6), 0.0   ;;  %v967_v41 = vmov (!%p845_p6), 0  }
  0x1a   : > { %v414_v12 = vsub.s32 1, %v407_v9  ;;  %v405_v15 = vld [vmem:[%s364_s23] sm:$0x3]  ;;  %v949_v18 = vld [vmem:[%s1041_s20 + $0x70] sm:$0xff]   ;;  %v410_v19 = vsub.s32 0, %v407_v9  ;;  %v951_v22 = vld [vmem:[%s1041_s20 + $0x78] sm:$0xff]   ;;  %906 = vmatprep.mubr.msk.f32.mxu1 (!%p845_p6), %vm965_vm7, %v966_v38  ;;  %953 = vset.pattern.permute.xlu0 (!%p845_p6), %v967_v41 }
  0x1b   : > { %v950_v21 = vld [vmem:[%s1041_s20 + $0x30] sm:$0xff]   ;;  %v952_v24 = vld [vmem:[%s1041_s20 + $0x38] sm:$0xff]   ;;  %v424_v26 = vld [vmem:[#allocation2] sm:$0xf]  ;;  %vm968_vm8 = vmmov (!%p845_p6), 1   ;;  %vm610_vm10 = vcmask (!%p845_p6), 244736  }
  0x1c   : > { %858 = vmatpush3.bf16.msra.mxu0 %v940_v4  ;;  %v415_v16 = vrot.slane %v405_v15, %v414_v12  ;;  %v411_v23 = vrot.slane %v405_v15, %v410_v19  ;;  %v606_v32 = vld [vmem:[%s1123_s4] sm:$0xff] (!%p845_p6)  ;;  %v607_v33 = vld [vmem:[%s1123_s4 + $0x8] sm:$0xff] (!%p845_p6)  ;;  %v608_v34 = vld [vmem:[%s1123_s4 + $0x10] sm:$0xff] (!%p845_p6)  ;;  %vm702_vm12 = vcmask (!%p845_p6), 261120   ;;  %vm776_vm13 = vcmask (!%p845_p6), 11264  }
  0x1d   : > { %859 = vmatprep.subr.bf16.mxu0 %v941_v5  ;;  %v910_v36 = vpack.c.bf16 (!%p845_p6), %v607_v33, %v606_v32  ;;  %v609_v37 = vld [vmem:[%s1123_s4 + $0x18] sm:$0x3f] (!%p845_p6)  ;;  %v569_v39 = vld [vmem:[%s1121_s2] sm:$0xf] (!%p845_p6)  ;;  %vm914_vm9 = vmpackc.low (!%p845_p6), %vm614_vm6, %vm968_vm8 }
  0x1e   : > { %vm417_vm1 = vcmp.eq.s32.totalorder %v407_v9, %v415_v16  ;;  %vm416_vm3 = vcmp.eq.s32.totalorder %v407_v9, %v411_v23  ;;  %v913_v40 = vpack.c.bf16 (!%p845_p6), %v609_v37, %v608_v34  ;;  %573 = vperm.xlu0 (!%p845_p6), %953, %v569_v39   ;;  %v583_v42 = vld [vmem:[%s1122_s3] sm:$0xf] (!%p845_p6)  ;;  %v692_v45 = vld [vmem:[%s1127_s8 + $0x8] sm:$0xff] (!%p845_p6)  ;;  %v693_v47 = vld [vmem:[%s1127_s8 + $0x10] sm:$0xff] (!%p845_p6) }
  0x1f   : > { %vm841_vm2 = vmpackc.low %vm417_vm1, %vm417_vm1  ;;  %v691_v44 = vld [vmem:[%s1127_s8] sm:$0xff] (!%p845_p6)  ;;  %v694_v48 = vld [vmem:[%s1127_s8 + $0x18] sm:$0xff] (!%p845_p6) }
  0x20   : > { %860 = vmatpush3.bf16.msra.mxu0 %v942_v7  ;;  %842 = vmatprep.mubr.msk.bf16.mxu0 %vm841_vm2, %v963_v20  ;;  %vm843_vm4 = vmpackc.low %vm416_vm3, %vm416_vm3  ;;  %v917_v46 = vpack.c.bf16 (!%p845_p6), %v692_v45, %v691_v44  ;;  %v920_v49 = vpack.c.bf16 (!%p845_p6), %v694_v48, %v693_v47  ;;  %v846_v51 = vld [vmem:[%s1124_s5] ss:$0 sm:$0xff] (!%p845_p6) }
  0x21   : > { %861 = vmatprep.subr.bf16.mxu0 %v943_v8  ;;  %v847_v52 = vld [vmem:[%s1125_s6] ss:$0 sm:$0xff] (!%p845_p6) }
  0x22   : > { %587 = vperm.xlu0 (!%p845_p6), %953, %v583_v42   ;;  %918 = vmatpush3.bf16.msra.mxu1 (!%p845_p6), %v917_v46  ;;  %v848_v57 = vld [vmem:[%s1126_s7] ss:$0 sm:$0xff] (!%p845_p6) }
  0x23   : > { %919 = vmatprep.subr.bf16.mxu1 (!%p845_p6), %v964_v35  ;;  %v851_v0 = vld [vmem:[%s1128_s9] ss:$0 sm:$0xff] (!%p845_p6) }
  0x24   : > { %862 = vmatpush3.bf16.msra.mxu0 %v944_v10 }
  0x25   : > { %863 = vmatprep.subr.bf16.mxu0 %v945_v11 }
  0x26   : > { %921 = vmatpush3.bf16.msra.mxu1 (!%p845_p6), %v920_v49 }
  0x28   : > { %864 = vmatpush3.bf16.msra.mxu0 %v946_v13 }
  0x29   : > { %865 = vmatprep.subr.bf16.mxu0 %v947_v14 }
  0x2c   : > { %866 = vmatpush3.bf16.msra.mxu0 %v948_v17 }
  0x2d   : > { %867 = vmatprep.subr.bf16.mxu0 %v949_v18 }
  0x30   : > { %868 = vmatpush3.bf16.msra.mxu0 %v950_v21 }
  0x31   : > { %869 = vmatprep.subr.bf16.mxu0 %v951_v22 }
  0x34   : > { %870 = vmatpush3.bf16.msra.mxu0 %v952_v24 }
  0x35   : > { %909 = vmatprep.subr.bf16.mxu0 (!%p845_p6), %v964_v35 }
  0x37   : > { %844 = vmatmul.mubr.msk.bf16.vlgmr.msra.gmra.mrb[0].mxu0 %vm843_vm4, %v963_v20 }
  0x38   : > { %895 = vmatprep.mubr.msk.f32.mxu0 (!%p845_p6), %vm965_vm7, %v966_v38  ;;  %911 = vmatpush3.bf16.msra.mxu0 (!%p845_p6), %v910_v36 }
  0x39   : > { %912 = vmatprep.subr.bf16.mxu0 (!%p845_p6), %v964_v35 }
  0x3c   : > { %915 = vmatpush3.bf16.msk.msra.mxu0 (!%p845_p6), %vm914_vm9, %v913_v40 }
  0x9d   : > { %v574_v50 = vpop.permute.xlu0 (!%p845_p6), %573 }
  0x9e   : > { %v582_v54 = vmul.f32 (!%p845_p6), %v846_v51, %v574_v50 }
  0xa1   : > { %v588_v53 = vpop.permute.xlu0 (!%p845_p6), %587 }
  0xa2   : > { %v596_v55 = vmul.f32 (!%p845_p6), %v847_v52, %v588_v53 }
  0xa4   : > { %v597_v56 = vadd.f32 (!%p845_p6), %v596_v55, %v582_v54 }
  0xa6   : > { %v605_v58 = vadd.f32 (!%p845_p6), %v848_v57, %v597_v56 }
 0x10a   : > { %v871_v25 = vpop.f32.mrb[0].mxu0  ;;  %567 = sbr.rel (%p845_p6) target bundleno = 712 (0x2c8), region = 68 }
 0x10b   : > { %v872_v27 = vpop.f32.mrb[1].mxu0 }
 0x10c   : > { %v873_v28 = vadd.f32 %v872_v27, %v871_v25  ;;  %v874_v29 = vpop.f32.mrb[2].mxu0 }
 0x10d   : > { %v875_v30 = vpop.f32.mrb[3].mxu0 }
 0x10e   : > { %v561_v31 = vadd.f32 %v873_v28, %v424_v26 }
 0x110   : > { %563 = vst.msk [vmem:[#allocation2] sm:$0xf] %vm562_vm5, %v561_v31 }
 0x117   : > { %v568_v43 = vld [vmem:[#allocation2] sm:$0xf] }
 0x118   : > { %896 = vmatmul.mubr.msk.f32.vlgmr.msra.gmra.mrb[0].mxu0 %vm610_vm10, %v568_v43 }
 0x1eb   : > { %v684_v59 = vpop.f32.mrb[0].mxu0 }
 0x1ec   : > { %v685_v60 = vadd.f32 %v684_v59, %v605_v58  ;;  %v897_v61 = vpop.f32.mrb[1].mxu0 }
 0x1ee   : > { %vm688_vm11 = vcmp.gt.f32.partialorder %v685_v60, 0.0  ;;  %v689_v62 = vmul.f32 0.01, %v685_v60 }
 0x1f0   : > { %v690_v63 = vsel %vm688_vm11, %v685_v60, %v689_v62 }
 0x1f1   : > { %907 = vmatmul.mubr.msk.f32.vlgmr.msra.gmra.mrb[0].mxu1 %vm702_vm12, %v690_v63 }
 0x2c4   : > { %v772_v1 = vpop.f32.mrb[0].mxu1 }
 0x2c5   : > { %v773_v2 = vadd.f32 %v851_v0, %v772_v1  ;;  %v908_v3 = vpop.f32.mrb[1].mxu1 }
 0x2c7   : > { %777 = vst.msk [vmem:[%s1129_s10] sm:$0xf] %vm776_vm13, %v773_v2 }
 0x2c8 PF: > { %s20_s13 = sadd.s32 1, %s960_s13  }
 0x2c9   : > { %p17_p7 = scmp.ge.s32.totalorder %s20_s13, 5  }
 0x2cb   :  { %19 = sbr.rel (!%p17_p7) target bundleno = 1 (0x1), region = 97 }

</bundles_post_ra>
